<compile_context>
chip_gen: v5e
topology: v5e:2x2
jax: 0.10.0
libtpu: 0.0.40
codegen_flags: <defaults>
</compile_context>

<pallas_src>
import jax
import jax.numpy as jnp
from jax.experimental import pallas as pl
from jax.experimental.pallas import tpu as pltpu


def channel_gate_kernel(x_ref, w1t_ref, b1_ref, w2t_ref, b2_ref, out_ref):
    # x_ref: (Bt, C, HW)   w1t_ref: (C, MID)  b1_ref: (1, MID)
    # w2t_ref: (MID, C)    b2_ref: (1, C)     out_ref: (Bt, C, HW)
    x = x_ref[...]                                           # (Bt, C, HW), input dtype

    # Global average pool over the spatial (lane) axis, in f32.
    pooled = jnp.mean(x.astype(jnp.float32), axis=-1)        # (Bt, C)

    # fc1 (1x1 conv == dense): pre-transposed weight, no in-kernel .T
    h = jnp.dot(pooled, w1t_ref[...],
                preferred_element_type=jnp.float32) + b1_ref[...]   # (Bt, MID)
    h = jnp.maximum(h, 0.0)                                          # ReLU

    # fc2 (1x1 conv == dense)
    g = jnp.dot(h, w2t_ref[...],
                preferred_element_type=jnp.float32) + b2_ref[...]   # (Bt, C)

    # Sigmoid gate (exp/recip go to the EUP slot).
    g = jax.nn.sigmoid(g)

    # Broadcast multiply in the input dtype (lane-dense store).
    out_ref[...] = (x * g.astype(x.dtype)[:, :, None]).astype(out_ref.dtype)


def _pick_batch_tile(B, per_batch_bytes, target_bytes=2 << 20):
    """Largest divisor of B whose block fits the byte budget, keeping >=2 grid
    steps when B >= 2 (so both v7x TensorCores get batch groups)."""
    best = 1
    for d in range(1, B + 1):
        if B % d != 0:
            continue
        if d * per_batch_bytes > target_bytes:
            continue
        if B >= 2 and (B // d) < 2:
            continue
        best = d
    return best


def channel_gate(x_nchw, w1, b1, w2, b2):
    """x_nchw: (B, C, H, W); w1: (MID, C); b1: (MID,); w2: (C, MID); b2: (C,).
    Returns (B, C, H, W) = input * sigmoid(fc2(relu(fc1(avgpool(input)))))."""
    B, C, H, W = x_nchw.shape
    HW = H * W
    MID = w1.shape[0]

    x_flat = x_nchw.reshape(B, C, HW)

    # Pre-transpose weights once in the wrapper; reshape biases to 2D rows.
    w1t = jnp.transpose(w1)           # (C, MID)
    w2t = jnp.transpose(w2)           # (MID, C)
    b1_2d = b1.reshape(1, MID)
    b2_2d = b2.reshape(1, C)

    per_batch_bytes = C * HW * x_nchw.dtype.itemsize
    bt = _pick_batch_tile(B, per_batch_bytes)
    grid_b = B // bt

    out_flat = pl.pallas_call(
        channel_gate_kernel,
        out_shape=jax.ShapeDtypeStruct((B, C, HW), x_nchw.dtype),
        grid_spec=pltpu.PrefetchScalarGridSpec(
            num_scalar_prefetch=0,
            grid=(grid_b,),
            in_specs=[
                pl.BlockSpec((bt, C, HW), lambda b: (b, 0, 0)),  # x batch group
                pl.BlockSpec((C, MID), lambda b: (0, 0)),        # fc1 weight^T (constant)
                pl.BlockSpec((1, MID), lambda b: (0, 0)),        # fc1 bias
                pl.BlockSpec((MID, C), lambda b: (0, 0)),        # fc2 weight^T (constant)
                pl.BlockSpec((1, C), lambda b: (0, 0)),          # fc2 bias
            ],
            out_specs=pl.BlockSpec((bt, C, HW), lambda b: (b, 0, 0)),
        ),
        compiler_params=pltpu.CompilerParams(
            dimension_semantics=("parallel",)),
    )(x_flat, w1t, b1_2d, w2t, b2_2d)

    return out_flat.reshape(B, C, H, W)


def channel_gate_ref(x, w1, b1, w2, b2):
    """Pure-JAX reference replicating the PyTorch forward
    (layer_norm=False, gate_activation='sigmoid', return_gates=False)."""
    pooled = jnp.mean(x, axis=(2, 3))                     # (B, C)
    h = jnp.maximum(pooled @ w1.T + b1, 0.0)              # (B, MID)
    g = jax.nn.sigmoid(h @ w2.T + b2)                     # (B, C)
    return x * g[:, :, None, None]


if __name__ == "__main__":
    # Module config: in_channels=64, reduction=16 -> mid=4, num_gates=64,
    # gate_activation='sigmoid', layer_norm=False, return_gates=False.
    # TODO(synk): layer_norm=True branch (nn.LayerNorm on the pooled vector)
    # is not implemented since the default config disables it.
    B, C, H, W = 2, 64, 16, 16
    reduction = 16
    MID = C // reduction

    key = jax.random.PRNGKey(0)
    kx, kw1, kb1, kw2, kb2 = jax.random.split(key, 5)

    x = jax.random.normal(kx, (B, C, H, W), dtype=jnp.float32)

    # fc1: Conv2d(C, MID, 1) -> weight (MID, C, 1, 1) squeezed to (MID, C)
    w1 = jax.random.normal(kw1, (MID, C), dtype=jnp.float32) * 0.1
    b1 = jax.random.normal(kb1, (MID,), dtype=jnp.float32) * 0.1
    # fc2: Conv2d(MID, C, 1) -> weight (C, MID, 1, 1) squeezed to (C, MID)
    w2 = jax.random.normal(kw2, (C, MID), dtype=jnp.float32) * 0.1
    b2 = jax.random.normal(kb2, (C,), dtype=jnp.float32) * 0.1

    out = channel_gate(x, w1, b1, w2, b2)
    out = jax.block_until_ready(out)

    ref = channel_gate_ref(x, w1, b1, w2, b2)
    assert out.shape == (B, C, H, W)
    assert jnp.allclose(out, ref, atol=1e-5, rtol=1e-5), "mismatch vs reference"

    print("KERNEL_OK")
</pallas_src>

<mosaic_0001>
module attributes {stable_mosaic.version = 11 : i64} {
  func.func @channel_gate_kernel(%arg0: i32, %arg1: memref<1x64x256xf32, #tpu.memory_space<vmem>>, %arg2: memref<64x4xf32, #tpu.memory_space<vmem>>, %arg3: memref<1x4xf32, #tpu.memory_space<vmem>>, %arg4: memref<4x64xf32, #tpu.memory_space<vmem>>, %arg5: memref<1x64xf32, #tpu.memory_space<vmem>>, %arg6: memref<1x64x256xf32, #tpu.memory_space<vmem>>) attributes {dimension_semantics = [#tpu.dimension_semantics<parallel>], iteration_bounds = array<i64: 2>, scalar_prefetch = 0 : i64, scratch_operands = 0 : i64, tpu.core_type = #tpu.core_type<tc>, window_params = [{transform_indices = @transform_0, window_bounds = array<i64: 1, 64, 256>}, {pipeline_mode = #tpu.pipeline_mode<synchronous>, transform_indices = @transform_1, window_bounds = array<i64: 64, 4>}, {pipeline_mode = #tpu.pipeline_mode<synchronous>, transform_indices = @transform_2, window_bounds = array<i64: 1, 4>}, {pipeline_mode = #tpu.pipeline_mode<synchronous>, transform_indices = @transform_3, window_bounds = array<i64: 4, 64>}, {pipeline_mode = #tpu.pipeline_mode<synchronous>, transform_indices = @transform_4, window_bounds = array<i64: 1, 64>}, {transform_indices = @transform_5, window_bounds = array<i64: 1, 64, 256>}]} {
    %c0 = arith.constant 0 : index
    %c0_0 = arith.constant 0 : index
    %c0_1 = arith.constant 0 : index
    %0 = vector.load %arg1[%c0, %c0_0, %c0_1] : memref<1x64x256xf32, #tpu.memory_space<vmem>>, vector<1x64x256xf32>
    %cst = arith.constant dense<0.000000e+00> : vector<1x64xf32>
    %1 = vector.multi_reduction <add>, %0, %cst [2] : vector<1x64x256xf32> to vector<1x64xf32>
    %cst_2 = arith.constant 2.560000e+02 : f32
    %2 = vector.broadcast %cst_2 : f32 to vector<1x64xf32>
    %3 = arith.divf %1, %2 : vector<1x64xf32>
    %c0_3 = arith.constant 0 : index
    %c0_4 = arith.constant 0 : index
    %4 = vector.load %arg2[%c0_3, %c0_4] : memref<64x4xf32, #tpu.memory_space<vmem>>, vector<64x4xf32>
    %cst_5 = arith.constant dense<0.000000e+00> : vector<1x4xf32>
    %5 = tpu.matmul %3, %4, %cst_5 {dimension_numbers = #tpu.dot_dimension_numbers<[1], [0], [0], [1], [0, 0, 1, 1], [], []>} : vector<1x64xf32>, vector<64x4xf32>, vector<1x4xf32> -> vector<1x4xf32>
    %c0_6 = arith.constant 0 : index
    %c0_7 = arith.constant 0 : index
    %6 = vector.load %arg3[%c0_6, %c0_7] : memref<1x4xf32, #tpu.memory_space<vmem>>, vector<1x4xf32>
    %7 = arith.addf %5, %6 : vector<1x4xf32>
    %cst_8 = arith.constant 0.000000e+00 : f32
    %8 = vector.broadcast %cst_8 : f32 to vector<1x4xf32>
    %9 = arith.maximumf %7, %8 : vector<1x4xf32>
    %c0_9 = arith.constant 0 : index
    %c0_10 = arith.constant 0 : index
    %10 = vector.load %arg4[%c0_9, %c0_10] : memref<4x64xf32, #tpu.memory_space<vmem>>, vector<4x64xf32>
    %cst_11 = arith.constant dense<0.000000e+00> : vector<1x64xf32>
    %11 = tpu.matmul %9, %10, %cst_11 {dimension_numbers = #tpu.dot_dimension_numbers<[1], [0], [0], [1], [0, 0, 1, 1], [], []>} : vector<1x4xf32>, vector<4x64xf32>, vector<1x64xf32> -> vector<1x64xf32>
    %c0_12 = arith.constant 0 : index
    %c0_13 = arith.constant 0 : index
    %12 = vector.load %arg5[%c0_12, %c0_13] : memref<1x64xf32, #tpu.memory_space<vmem>>, vector<1x64xf32>
    %13 = arith.addf %11, %12 : vector<1x64xf32>
    %14 = arith.negf %13 : vector<1x64xf32>
    %15 = math.exp %14 : vector<1x64xf32>
    %cst_14 = arith.constant 1.000000e+00 : f32
    %16 = vector.broadcast %cst_14 : f32 to vector<1x64xf32>
    %17 = arith.addf %16, %15 : vector<1x64xf32>
    %18 = arith.divf %16, %17 : vector<1x64xf32>
    %19 = vector.shape_cast %18 : vector<1x64xf32> to vector<1x64x1xf32>
    %20 = vector.broadcast %19 : vector<1x64x1xf32> to vector<1x64x256xf32>
    %21 = arith.mulf %0, %20 : vector<1x64x256xf32>
    %c0_15 = arith.constant 0 : index
    %c0_16 = arith.constant 0 : index
    %c0_17 = arith.constant 0 : index
    %22 = vector.load %arg6[%c0_15, %c0_16, %c0_17] : memref<1x64x256xf32, #tpu.memory_space<vmem>>, vector<1x64x256xf32>
    tpu.vector_store %arg6[%c0_15, %c0_16, %c0_17], %21 {strides = array<i32>} : memref<1x64x256xf32, #tpu.memory_space<vmem>>, vector<1x64x256xf32>,
    return
  }
  func.func @transform_0(%arg0: i32) -> (i32, i32, i32) {
    %c0_i32 = arith.constant 0 : i32
    %c0_i32_0 = arith.constant 0 : i32
    %c0_i32_1 = arith.constant 0 : i32
    return %arg0, %c0_i32, %c0_i32_0 : i32, i32, i32
  }
  func.func @transform_1(%arg0: i32) -> (i32, i32) {
    %c0_i32 = arith.constant 0 : i32
    %c0_i32_0 = arith.constant 0 : i32
    %c0_i32_1 = arith.constant 0 : i32
    return %c0_i32, %c0_i32_0 : i32, i32
  }
  func.func @transform_2(%arg0: i32) -> (i32, i32) {
    %c0_i32 = arith.constant 0 : i32
    %c0_i32_0 = arith.constant 0 : i32
    %c0_i32_1 = arith.constant 0 : i32
    return %c0_i32, %c0_i32_0 : i32, i32
  }
  func.func @transform_3(%arg0: i32) -> (i32, i32) {
    %c0_i32 = arith.constant 0 : i32
    %c0_i32_0 = arith.constant 0 : i32
    %c0_i32_1 = arith.constant 0 : i32
    return %c0_i32, %c0_i32_0 : i32, i32
  }
  func.func @transform_4(%arg0: i32) -> (i32, i32) {
    %c0_i32 = arith.constant 0 : i32
    %c0_i32_0 = arith.constant 0 : i32
    %c0_i32_1 = arith.constant 0 : i32
    return %c0_i32, %c0_i32_0 : i32, i32
  }
  func.func @transform_5(%arg0: i32) -> (i32, i32, i32) {
    %c0_i32 = arith.constant 0 : i32
    %c0_i32_0 = arith.constant 0 : i32
    %c0_i32_1 = arith.constant 0 : i32
    return %arg0, %c0_i32, %c0_i32_0 : i32, i32, i32
  }
}

</mosaic_0001>

<bundles_post_ra>
// kernel: tpu_custom_call.1
= control target key start
LH: loop header
LB: loop body
LE: loop exit
PB: predicated region body
PF: predicated region fallthrough
CT: control target
= control target key end

     0   :  { %10 = vsyncpa [#allocation3], 0  ;;  %s1057_s0 = inlined_call_operand.hbm [shape: f32[2,64,256], index: 0, kind: input, shape index: {}]   ;;  %s1058_s1 = inlined_call_operand.vmem [shape: f32[64,4], index: 1, kind: input, shape index: {}]   ;;  %s1059_s2 = inlined_call_operand.vmem [shape: f32[1,4], index: 2, kind: input, shape index: {}]   ;;  %s1060_s3 = inlined_call_operand.vmem [shape: f32[4,64], index: 3, kind: input, shape index: {}]   ;;  %s1061_s4 = inlined_call_operand.vmem [shape: f32[1,64], index: 4, kind: input, shape index: {}]   ;;  %s1062_s5 = inlined_call_operand.hbm [shape: f32[2,64,256], index: 5, kind: output, shape index: {}]  }
   0x1   :  { %12 = vsyncpa [#allocation3 + $0x1], 0 }
   0x2   :  { %13 = vsyncpa [#allocation4], 0 }
   0x3   :  { %15 = vsyncpa [#allocation4 + $0x1], 0  ;;  %s810_s18 = smov 0   ;;  %s812_s19 = smov 0  }
   0x4   :  { %s814_s20 = smov 0   ;;  %s816_s21 = smov 0  }
   0x5 LB: > { %s831_s22 = sadd.s32 4294967295, %s773_s21   ;;  %s591_s23 = sadd.s32 4294967294, %s773_s21   ;;  %s773_s21 = sphi %s816_s21, %s1072_s21   ;;  %s769_s20 = sphi %s814_s20, %s1071_s20   ;;  %s765_s19 = sphi %s812_s19, %s1070_s19   ;;  %s761_s18 = sphi %s810_s18, %s1069_s18  }
   0x6   : > { %s835_s24 = sadd.s32 1, %s773_s21   ;;  %s28_s25 = sadd.s32 1, %s769_s20 }
   0x7   : > { %s25_s26 = ssub.s32 %s773_s21, %s835_s24  ;;  %p35_p0 = scmp.ne.s32.totalorder %s769_s20, %s765_s19 }
   0x8   : > { %p26_p1 = scmp.eq.s32.totalorder %s25_s26, 0  ;;  %p36_p2 = scmp.eq.s32.totalorder %s773_s21, 0 }
   0x9   : > { %p41_p3 = scmp.ne.s32.totalorder %s765_s19, %s761_s18  ;;  %p42_p4 = scmp.eq.s32.totalorder %s831_s22, 0 }
   0xa   : > { %s847_s27 = scalar_select %p26_p1, %s769_s20, %s28_s25  }
   0xb   : > { %p849_p5 = por %p36_p2, %p35_p0  ;;  %p853_p6 = por %p42_p4, %p41_p3 }
   0xc   : > { %p149_p7 = scmp.eq.s32.totalorder %s831_s22, 1  ;;  %p155_p8 = scmp.eq.s32.totalorder %s591_s23, 1 }
   0xd   : > { %p623_p10 = scmp.lt.s32.totalorder %s773_s21, 2  ;;  %s187_s7 = sand.u32 1, %s769_s20  }
   0xe   : > { %p860_p11 = por %p149_p7, %p35_p0  ;;  %p864_p12 = por %p155_p8, %p41_p3 }
   0xf   : > { %s609_s8 = sshll.u32 %s773_s21, 7  ;;  %s594_s9 = sshll.u32 %s187_s7, 7 }
  0x10   : > { %s196_s12 = scalar_lea.hbm %s1057_s0, %s609_s8  ;;  %s191_s14 = scalar_lea.vmem [#allocation2], %s594_s9 }
  0x11   : > { %s197_s13 = sshll.u32 %s196_s12, 4  ;;  %s199_s15 = sshll.u32 %s191_s14, 4  ;;  %s198_s13 = int_to_ptr.hbm [resolvable:$true] %s197_s13  ;;  %s200_s15 = int_to_ptr.vmem [resolvable:$true] %s199_s15 }
  0x12   : > { %p875_p13 = pnand %p623_p10, %p849_p5  ;;  %p597_p0 = scmp.ge.s32.totalorder %s773_s21, 1 }
  0x13   : > { %p207_p1 = scmp.lt.s32.totalorder %s773_s21, 3  ;;  %s188_s17 = scalar_lea.sflag [#allocation3], %s187_s7 }
  0x14   : > { %s677_s23 = sshra.s32 %s198_s13, 4  ;;  %p681_p3 = pneg %p875_p13  ;;  %s678_s23 = int_to_ptr.hbm [resolvable:$true] %s677_s23 }
  0x15   : > { %s679_s25 = scalar_lea.hbm %s678_s23, 128  ;;  %s684_s28 = scalar_lea.hbm %s1057_s0, 256 }
  0x16   : > { %p680_p2 = scmp.ne.s32.totalorder %s678_s23, %s679_s25  ;;  %p685_p5 = scmp.lt.s32.totalorder %s678_s23, %s1057_s0 }
  0x17   : > { %p686_p8 = scmp.lt.s32.totalorder %s684_s28, %s679_s25 }
  0x18   : > { %p682_p4 = pnand %p681_p3, %p680_p2 }
  0x19   : > { %p687_p10 = por %p686_p8, %p685_p5 }
  0x1a   : > { %p683_p7 = pneg %p682_p4 }
  0x1c   : > { %p688_p9 = pnand %p687_p10, %p683_p7 }
  0x1e   : > { %691 = shalt.err (!%p688_p9)
}
  0x1f   : > { %s775_s7 = smov 256   ;;  %s776_s11 = smov 16  }
  0x20   : > { %618 = dma.hbm_to_vmem [thread:$0]  (!%p875_p13), %s198_s13, 2048, %s200_s15, %s188_s17, %s775_s7, %s775_s7, %s776_s11  }
  0x21   : > { %p208_p2 = pnand %p597_p0, %p207_p1 }
  0x22   : > { %s896_s12 = sand.u32 (!%p208_p2), 1, %s765_s19  }
  0x23   : > { %211 = sbr.rel (%p208_p2) target bundleno = 624 (0x270), region = 40  ;;  %s598_s14 = sshll.u32 (!%p208_p2), %s896_s12, 7 }
  0x24   : > { %s214_s23 = scalar_lea.sflag (!%p208_p2), [#allocation3], %s896_s12  ;;  %s217_s25 = scalar_lea.vmem (!%p208_p2), [#allocation2], %s598_s14 }
  0x28   : > { %752 = dma.done.wait (%p853_p6), %s214_s23, 2048  }
  0x29   : > { %754 = vsyncadd (%p853_p6), %s214_s23, 4294965248  ;;  %v906_v0 = vld [vmem:[%s217_s25] sm:$0xff]  ;;  %v908_v1 = vld [vmem:[%s217_s25 + $0x8] sm:$0xff]  ;;  %v777_v26 = vmov 256.0   ;;  %v317_v38 = vlaneseq  ;;  %vm322_vm1 = vcmask 130112   ;;  %vm326_vm2 = vcmask 195712  }
  0x2a   : > { %v910_v2 = vld [vmem:[%s217_s25 + $0x20] sm:$0xff]  ;;  %v261_v3 = vadd.f32 %v908_v1, %v906_v0  ;;  %v914_v4 = vld [vmem:[%s217_s25 + $0x28] sm:$0xff]  ;;  %v924_v9 = vld [vmem:[%s217_s25 + $0x10] sm:$0xff]  ;;  %671 = vrcp.f32 %v777_v26  ;;  %vm330_vm3 = vcmask 261312   ;;  %vm334_vm4 = vcmask 326912   ;;  %s991_s9 = scalar_lea.vmem [#allocation5], %s598_s14 }
  0x2b   : > { %v916_v5 = vld [vmem:[%s217_s25 + $0x40] sm:$0xff]  ;;  %v918_v6 = vld [vmem:[%s217_s25 + $0x48] sm:$0xff]  ;;  %v267_v7 = vadd.f32 %v914_v4, %v910_v2  ;;  %v926_v10 = vld [vmem:[%s217_s25 + $0x18] sm:$0xff]  ;;  %v318_v43 = vand.u32 127, %v317_v38  ;;  %vm338_vm5 = vcmask 392512   ;;  %vm342_vm6 = vcmask 458112  }
  0x2c   : > { %v273_v8 = vadd.f32 %v918_v6, %v916_v5  ;;  %262 = vadd.xlane.f32.xlu0 %v261_v3  ;;  %v928_v11 = vld [vmem:[%s217_s25 + $0x30] sm:$0xff]  ;;  %v930_v12 = vld [vmem:[%s217_s25 + $0x38] sm:$0xff]  ;;  %v264_v15 = vadd.f32 %v926_v10, %v924_v9  ;;  %v942_v18 = vld [vmem:[%s217_s25 + $0x60] sm:$0xff]  ;;  %vm346_vm7 = vcmask 523712   ;;  %vm348_vm8 = vcmask 523264   ;;  %s610_s14 = sshll.u32 %s831_s22, 7 }
  0x2d   : > { %268 = vadd.xlane.f32.xlu1 %v267_v7  ;;  %v932_v13 = vld [vmem:[%s217_s25 + $0x50] sm:$0xff]  ;;  %v934_v14 = vld [vmem:[%s217_s25 + $0x58] sm:$0xff]  ;;  %v270_v16 = vadd.f32 %v930_v12, %v928_v11  ;;  %v944_v19 = vld [vmem:[%s217_s25 + $0x68] sm:$0xff]  ;;  %v320_v45 = vadd.s32 4294967288, %v318_v43  ;;  %v324_v46 = vadd.s32 4294967280, %v318_v43  ;;  %v328_v49 = vadd.s32 4294967272, %v318_v43  ;;  %s514_s11 = scalar_lea.hbm %s1062_s5, %s610_s14 }
  0x2e   : > { %274 = vadd.xlane.f32.xlu2 %v273_v8  ;;  %v276_v17 = vadd.f32 %v934_v14, %v932_v13  ;;  %v946_v20 = vld [vmem:[%s217_s25 + $0x70] sm:$0xff]  ;;  %v948_v21 = vld [vmem:[%s217_s25 + $0x78] sm:$0xff]  ;;  %v279_v22 = vadd.f32 %v944_v19, %v942_v18  ;;  %v305_v27 = vld [vmem:[%s1058_s1 + $0x28] sm:$0xff]  ;;  %v332_v53 = vadd.s32 4294967264, %v318_v43  ;;  %v336_v60 = vadd.s32 4294967256, %v318_v43  ;;  %s515_s23 = sshll.u32 %s991_s9, 4  ;;  %s516_s23 = int_to_ptr.vmem [resolvable:$true] %s515_s23 }
  0x2f   : > { %v282_v23 = vadd.f32 %v948_v21, %v946_v20  ;;  %v307_v24 = vld [vmem:[%s1058_s1 + $0x38] sm:$0xff]  ;;  %v306_v25 = vld [vmem:[%s1058_s1 + $0x30] sm:$0xff]  ;;  %v304_v28 = vld [vmem:[%s1058_s1 + $0x20] sm:$0xff]  ;;  %v340_v8 = vadd.s32 4294967248, %v318_v43  ;;  %vm378_vm9 = vcmask 1043456   ;;  %vm374_vm10 = vcmask 31744  }
  0x30   : > { %359 = vmatpush.msra.mxu0 %v307_v24  ;;  %v303_v29 = vld [vmem:[%s1058_s1 + $0x18] sm:$0xff]  ;;  %v672_v30 = vpop.eup %671  ;;  %v302_v31 = vld [vmem:[%s1058_s1 + $0x10] sm:$0xff]  ;;  %v301_v32 = vld [vmem:[%s1058_s1 + $0x8] sm:$0xff]  ;;  %s517_s25 = sshll.u32 %s514_s11, 4  ;;  %s503_s22 = scalar_lea.sflag [#allocation4], %s896_s12  ;;  %s518_s25 = int_to_ptr.hbm [resolvable:$true] %s517_s25 }
  0x31   : > { %v286_v33 = vmul.f32 256.0, %v672_v30  ;;  %v300_v34 = vld [vmem:[%s1058_s1] sm:$0xff]  ;;  %vm290_vm0 = vweird.f32 %v672_v30  ;;  %s721_s29 = sshra.s32 %s518_s25, 4  ;;  %s727_s17 = scalar_lea.hbm %s1062_s5, 256  ;;  %s722_s29 = int_to_ptr.hbm [resolvable:$true] %s721_s29 }
  0x32   : > { %360 = vmatpush.msra.mxu0 %v306_v25  ;;  %s723_s13 = scalar_lea.hbm %s722_s29, 128  ;;  %p728_p0 = scmp.lt.s32.totalorder %s722_s29, %s1062_s5 }
  0x33   : > { %v287_v35 = vsub.f32 1.0, %v286_v33  ;;  %p724_p6 = scmp.ne.s32.totalorder %s722_s29, %s723_s13  ;;  %p729_p1 = scmp.lt.s32.totalorder %s727_s17, %s723_s13 }
  0x34   : > { %265 = vadd.xlane.f32.xlu0 %v264_v15  ;;  %361 = vmatpush.msra.mxu0 %v305_v27 }
  0x35   : > { %271 = vadd.xlane.f32.xlu1 %v270_v16  ;;  %v288_v36 = vmul.f32 %v672_v30, %v287_v35  ;;  %p725_p9 = pnand %p724_p6, %p860_p11  ;;  %p730_p3 = por %p729_p1, %p728_p0 }
  0x36   : > { %277 = vadd.xlane.f32.xlu2 %v276_v17  ;;  %362 = vmatpush.msra.mxu0 %v304_v28  ;;  %v344_v17 = vadd.s32 4294967240, %v318_v43 }
  0x37   : > { %v289_v37 = vadd.f32 %v672_v30, %v288_v36  ;;  %v423_v36 = vshrl.u32 %v317_v38, 7  ;;  %p726_p13 = pneg %p725_p9 }
  0x38   : > { %363 = vmatpush.msra.mxu0 %v303_v29 }
  0x39   : > { %v291_v42 = vsel %vm290_vm0, %v672_v30, %v289_v37  ;;  %662 = vset.pattern.permute.xlu2 %v423_v36  ;;  %v436_v37 = vadd.s32 16, %v423_v36  ;;  %p731_p4 = pnand %p730_p3, %p726_p13 }
  0x3a   : > { %364 = vmatpush.msra.mxu0 %v302_v31  ;;  %v372_v31 = vld [vmem:[%s1060_s3] sm:$0xf] }
  0x3b   : > { %601 = vmatpush.msk.msra.mxu1 %vm378_vm9, %v372_v31  ;;  %664 = vset.pattern.permute.xlu1 %v436_v37 }
  0x3c   : > { %280 = vadd.xlane.f32.xlu0 %v279_v22  ;;  %365 = vmatpush.msra.mxu0 %v301_v32  ;;  %v308_v32 = vld [vmem:[%s1059_s2] sm:$0x1] }
  0x3d   : > { %283 = vadd.xlane.f32.xlu1 %v282_v23 }
  0x3e   : > { %366 = vmatpush.msra.mxu0 %v300_v34 }
  0x9f   : > { %v263_v39 = vpop.xlane.xlu0 %262 }
  0xa0   : > { %v269_v40 = vpop.xlane.xlu1 %268  ;;  %v292_v44 = vmul.f32 %v291_v42, %v263_v39  ;;  %v430_v39 = vadd.s32 8, %v423_v36 }
  0xa1   : > { %v275_v41 = vpop.xlane.xlu2 %274  ;;  %v294_v47 = vmul.f32 %v291_v42, %v269_v40  ;;  %v373_v40 = vld [vmem:[%s1061_s4] sm:$0x1] }
  0xa2   : > { %v319_v55 = vperm.slane %v292_v44, %v318_v43  ;;  %v296_v56 = vmul.f32 %v291_v42, %v275_v41  ;;  %663 = vset.pattern.permute.xlu0 %v430_v39 }
  0xa3   : > { %v325_v58 = vperm.slane %v294_v47, %v324_v46 }
  0xa4   : > { %v333_v3 = vperm.slane %v296_v56, %v332_v53  ;;  %v454_v56 = vadd.s32 40, %v423_v36 }
  0xa7   : > { %v266_v48 = vpop.xlane.xlu0 %265 }
  0xa8   : > { %v293_v50 = vmul.f32 %v291_v42, %v266_v48  ;;  %v272_v51 = vpop.xlane.xlu1 %271 }
  0xa9   : > { %v278_v52 = vpop.xlane.xlu2 %277  ;;  %v295_v54 = vmul.f32 %v291_v42, %v272_v51 }
  0xaa   : > { %v321_v57 = vperm.slane %v293_v50, %v320_v45  ;;  %v297_v61 = vmul.f32 %v291_v42, %v278_v52 }
  0xab   : > { %v329_v59 = vperm.slane %v295_v54, %v328_v49 }
  0xac   : > { %v323_v62 = vsel %vm322_vm1, %v321_v57, %v319_v55  ;;  %v337_v15 = vperm.slane %v297_v61, %v336_v60  ;;  %v442_v57 = vadd.s32 24, %v423_v36  ;;  %v460_v60 = vadd.s32 48, %v423_v36 }
  0xad   : > { %v327_v63 = vsel %vm326_vm2, %v325_v58, %v323_v62  ;;  %v466_v58 = vadd.s32 56, %v423_v36 }
  0xae   : > { %v331_v7 = vsel %vm330_vm3, %v329_v59, %v327_v63  ;;  %v448_v59 = vadd.s32 32, %v423_v36 }
  0xaf   : > { %v281_v16 = vpop.xlane.xlu0 %280  ;;  %v335_v24 = vsel %vm334_vm4, %v333_v3, %v331_v7 }
  0xb0   : > { %v298_v22 = vmul.f32 %v291_v42, %v281_v16  ;;  %v284_v23 = vpop.xlane.xlu1 %283  ;;  %v339_v28 = vsel %vm338_vm5, %v337_v15, %v335_v24 }
  0xb1   : > { %v299_v25 = vmul.f32 %v291_v42, %v284_v23 }
  0xb2   : > { %v341_v26 = vperm.slane %v298_v22, %v340_v8 }
  0xb3   : > { %v345_v27 = vperm.slane %v299_v25, %v344_v17 }
  0xb4   : > { %v343_v29 = vsel %vm342_vm6, %v341_v26, %v339_v28 }
  0xb5   : > { %v347_v30 = vsel %vm346_vm7, %v345_v27, %v343_v29 }
  0xb6   : > { %600 = vmatmul.msk.f32.vlgmr.msra.gmra.mxu0 %vm348_vm8, %v347_v30 }
 0x133   : > { %v368_v33 = vpop.f32.mrf.mxu0 }
 0x134   : > { %v369_v34 = vadd.f32 %v368_v33, %v308_v32 }
 0x136   : > { %v371_v35 = vmax.f32 %v369_v34, 0.0 }
 0x138   : > { %602 = vmatmul.msk.f32.vlgmr.msra.gmra.mxu1 %vm374_vm10, %v371_v35 }
 0x1b5   : > { %v399_v41 = vpop.f32.mrf.mxu1 }
 0x1b6   : > { %v400_v42 = vadd.f32 %v399_v41, %v373_v40 }
 0x1b8   : > { %v603_v43 = vmul.f32 -1.442695, %v400_v42 }
 0x1ba   : > { %673 = vpow2.f32 %v603_v43 }
 0x1c0   : > { %v674_v44 = vpop.eup %673 }
 0x1c1   : > { %v405_v45 = vadd.f32 1.0, %v674_v44 }
 0x1c3   : > { %675 = vrcp.f32 %v405_v45  ;;  %v417_v38 = vand.u32 2147483648, %v405_v45  ;;  %v415_v50 = vand.u32 2147483647, %v405_v45  ;;  %vm411_vm12 = vweird.f32 %v405_v45 }
 0x1c5   : > { %v418_v52 = vor.u32 1.1754944e-38, %v417_v38  ;;  %vm416_vm14 = vcmp.eq.f32.partialorder %v415_v50, 8.507059e+37 }
 0x1c9   : > { %v676_v46 = vpop.eup %675 }
 0x1ca   : > { %v407_v47 = vmul.f32 %v676_v46, %v405_v45  ;;  %vm412_vm11 = vweird.f32 %v676_v46 }
 0x1cb   : > { %vm413_vm13 = vmor %vm411_vm12, %vm412_vm11 }
 0x1cc   : > { %v408_v48 = vsub.f32 1.0, %v407_v47 }
 0x1ce   : > { %v409_v49 = vmul.f32 %v676_v46, %v408_v48 }
 0x1d0   : > { %v410_v51 = vadd.f32 %v676_v46, %v409_v49 }
 0x1d2   : > { %v414_v53 = vsel %vm413_vm13, %v676_v46, %v410_v51 }
 0x1d3   : > { %v419_v54 = vsel %vm416_vm14, %v418_v52, %v414_v53 }
 0x1d4   : > { %v421_v55 = vperm.slane %v419_v54, 0 }
 0x1d6   : > { %438 = vperm.xlu1 %664, %v421_v55   ;;  %432 = vperm.xlu0 %663, %v421_v55  }
 0x1d7   : > { %426 = vperm.xlu2 %662, %v421_v55  }
 0x1de   : > { %667 = vset.pattern.permute.xlu1 %v454_v56  ;;  %670 = vset.pattern.permute.xlu0 %v466_v58 }
 0x1df   : > { %665 = vset.pattern.permute.xlu2 %v442_v57 }
 0x1e6   : > { %456 = vperm.xlu1 %667, %v421_v55  }
 0x1e7   : > { %444 = vperm.xlu2 %665, %v421_v55  }
 0x1ee   : > { %669 = vset.pattern.permute.xlu1 %v466_v58 }
 0x1ef   : > { %666 = vset.pattern.permute.xlu2 %v448_v59 }
 0x1f6   : > { %468 = vperm.xlu1 %669, %v421_v55  }
 0x1f7   : > { %450 = vperm.xlu2 %666, %v421_v55  }
 0x1ff   : > { %668 = vset.pattern.permute.xlu2 %v460_v60 }
 0x207   : > { %462 = vperm.xlu2 %668, %v421_v55  }
 0x231   : > { %v427_v61 = vpop.permute.xlu2 %426 }
 0x232   : > { %v470_v62 = vmul.f32 %v427_v61, %v906_v0  ;;  %v471_v63 = vmul.f32 %v427_v61, %v908_v1 }
 0x234   : > { %486 = vst [vmem:[%s991_s9] sm:$0xff] %v470_v62 }
 0x235   : > { %487 = vst [vmem:[%s991_s9 + $0x8] sm:$0xff] %v471_v63 }
 0x241   : > { %v445_v3 = vpop.permute.xlu2 %444 }
 0x242   : > { %v476_v7 = vmul.f32 %v445_v3, %v928_v11  ;;  %v477_v0 = vmul.f32 %v445_v3, %v930_v12 }
 0x244   : > { %492 = vst [vmem:[%s991_s9 + $0x30] sm:$0xff] %v476_v7 }
 0x245   : > { %493 = vst [vmem:[%s991_s9 + $0x38] sm:$0xff] %v477_v0 }
 0x248   : > { %v439_v1 = vpop.permute.xlu1 %438  ;;  %v433_v8 = vpop.permute.xlu0 %432 }
 0x249   : > { %v474_v15 = vmul.f32 %v439_v1, %v910_v2  ;;  %v475_v16 = vmul.f32 %v439_v1, %v914_v4  ;;  %v472_v17 = vmul.f32 %v433_v8, %v924_v9  ;;  %v473_v22 = vmul.f32 %v433_v8, %v926_v10 }
 0x24b   : > { %490 = vst [vmem:[%s991_s9 + $0x20] sm:$0xff] %v474_v15 }
 0x24c   : > { %491 = vst [vmem:[%s991_s9 + $0x28] sm:$0xff] %v475_v16 }
 0x24d   : > { %488 = vst [vmem:[%s991_s9 + $0x10] sm:$0xff] %v472_v17 }
 0x24e   : > { %489 = vst [vmem:[%s991_s9 + $0x18] sm:$0xff] %v473_v22 }
 0x251   : > { %v451_v11 = vpop.permute.xlu2 %450 }
 0x252   : > { %v478_v12 = vmul.f32 %v451_v11, %v916_v5  ;;  %v479_v2 = vmul.f32 %v451_v11, %v918_v6 }
 0x254   : > { %494 = vst [vmem:[%s991_s9 + $0x40] sm:$0xff] %v478_v12 }
 0x255   : > { %495 = vst [vmem:[%s991_s9 + $0x48] sm:$0xff] %v479_v2 }
 0x258   : > { %v457_v4 = vpop.permute.xlu1 %456 }
 0x259   : > { %v480_v9 = vmul.f32 %v457_v4, %v932_v13  ;;  %v481_v23 = vmul.f32 %v457_v4, %v934_v14 }
 0x25b   : > { %496 = vst [vmem:[%s991_s9 + $0x50] sm:$0xff] %v480_v9 }
 0x25c   : > { %497 = vst [vmem:[%s991_s9 + $0x58] sm:$0xff] %v481_v23 }
 0x261   : > { %v463_v10 = vpop.permute.xlu2 %462 }
 0x262   : > { %v482_v24 = vmul.f32 %v463_v10, %v942_v18  ;;  %v483_v5 = vmul.f32 %v463_v10, %v944_v19 }
 0x264   : > { %498 = vst [vmem:[%s991_s9 + $0x60] sm:$0xff] %v482_v24 }
 0x265   : > { %499 = vst [vmem:[%s991_s9 + $0x68] sm:$0xff] %v483_v5 }
 0x268   : > { %v469_v6 = vpop.permute.xlu1 %468 }
 0x269   : > { %v484_v13 = vmul.f32 %v469_v6, %v946_v20  ;;  %v485_v14 = vmul.f32 %v469_v6, %v948_v21 }
 0x26b   : > { %500 = vst [vmem:[%s991_s9 + $0x70] sm:$0xff] %v484_v13 }
 0x26c   : > { %501 = vst [vmem:[%s991_s9 + $0x78] sm:$0xff] %v485_v14 }
 0x26d   : > { %734 = shalt.err (!%p731_p4)
}
 0x26e   : > { %s778_s12 = smov 256   ;;  %s779_s28 = smov 16  }
 0x26f   : > { %613 = dma.vmem_to_hbm [thread:$0]  (%p860_p11), %s516_s23, 2048, %s518_s25, %s503_s22, %s778_s12, %s778_s12, %s779_s28  }
 0x270 PF: > { %s532_s9 = sand.u32 1, %s761_s18   ;;  %p1068_p7 = scmp.ge.s32.totalorder %s773_s21, 2 }
 0x271   : > { %s533_s14 = scalar_lea.sflag [#allocation4], %s532_s9 }
 0x272   : > { %p620_p5 = pnand %p1068_p7, %p864_p12 }
 0x274   : > { %p621_p8 = pneg %p620_p5 }
 0x276   : > { %756 = dma.done.wait (%p621_p8), %s533_s14, 2048  }
 0x277   : > { %758 = vsyncadd (%p621_p8), %s533_s14, 4294965248  ;;  %p18_p10 = scmp.ge.s32.totalorder %s835_s24, 4   ;;  %s1069_s18 = smov %s765_s19 }
 0x278   : > { %s1070_s19 = smov %s769_s20  ;;  %s1071_s20 = smov %s847_s27 }
 0x279   : > { %s1072_s21 = smov %s835_s24  ;;  %20 = sbr.rel (!%p18_p10) target bundleno = 5 (0x5), region = 85 }
 0x27e   :  { %539 = vsyncpa [#allocation3], 1 }
 0x27f   :  { %541 = vsyncpa [#allocation3 + $0x1], 1 }
 0x280   :  { %542 = vsyncpa [#allocation4], 1 }
 0x281   :  { %544 = vsyncpa [#allocation4 + $0x1], 1 }

</bundles_post_ra>
